<compile_context>
chip_gen: v7x
topology: tpu7x:2x2x1
jax: 0.10.0
libtpu: 0.0.40
codegen_flags: <defaults>
</compile_context>

<pallas_src>
import jax
import jax.numpy as jnp
from jax.experimental import pallas as pl
from jax.experimental.pallas import tpu as pltpu


def _quadratic_kernel(x_ref, a_ref, b_ref, c_ref, o_ref):
    # x_ref: (TB, n) VMEM   — TB batch rows of the point x
    # a_ref: (n, n)  VMEM   — resident across the whole grid
    # b_ref: (1, n)  VMEM   — resident across the whole grid
    # c_ref: (1,)    SMEM   — scalar offset
    # o_ref: (TB, 1) VMEM   — one f(x) value per batch row
    x = x_ref[...]                                   # (TB, n) f32
    a = a_ref[...]                                   # (n, n)  f32
    n = a.shape[0]

    # xa[t, j] = sum_i x[t, i] * A[i, j]
    # Pure VPU: unrolled over the tiny static n; each step is a lane-broadcast
    # of one x column times a sublane-broadcast of one A row.  No MXU.
    xa = jnp.zeros_like(x)
    for i in range(n):
        xa = xa + x[:, i:i + 1] * a[i:i + 1, :]      # (TB,1)*(1,n) -> (TB,n)

    quad = jnp.sum(xa * x, axis=-1, keepdims=True)           # (TB, 1)  x^T A x
    lin = jnp.sum(x * b_ref[...], axis=-1, keepdims=True)    # (TB, 1)  b^T x
    o_ref[...] = 0.5 * quad + lin + c_ref[0]


def quadratic2_forward_batched(xs, a, b, c, *, block_b=8):
    """f(x) for a batch of points xs: (B, n) -> (B,).

    block_b is the per-grid-step batch tile (a multiple of 8 sublanes); raise
    it (e.g. 128-512) for large B so each step does more work per launch.
    """
    B, n = xs.shape
    assert a.shape == (n, n) and b.shape == (n,)

    xs = xs.astype(jnp.float32)
    a2 = a.astype(jnp.float32)
    b2 = b.astype(jnp.float32).reshape(1, n)
    c2 = jnp.asarray(c, jnp.float32).reshape((1,))

    # Pad only the (cheap, per-call) batch axis up to a sublane-tile multiple.
    # Parameters A / b / c are passed raw — no per-call padding fusions.
    num_blocks = pl.cdiv(B, block_b)
    b_pad = num_blocks * block_b
    if b_pad != B:
        xs = jnp.concatenate(
            [xs, jnp.zeros((b_pad - B, n), jnp.float32)], axis=0)

    out = pl.pallas_call(
        _quadratic_kernel,
        out_shape=jax.ShapeDtypeStruct((b_pad, 1), jnp.float32),
        grid=(num_blocks,),
        in_specs=[
            pl.BlockSpec((block_b, n), lambda i: (i, 0)),   # x: tile over batch
            pl.BlockSpec((n, n), lambda i: (0, 0)),          # A: resident
            pl.BlockSpec((1, n), lambda i: (0, 0)),          # b: resident
            pl.BlockSpec(memory_space=pltpu.MemorySpace.SMEM),  # c: scalar
        ],
        out_specs=pl.BlockSpec((block_b, 1), lambda i: (i, 0)),
        compiler_params=pltpu.CompilerParams(
            dimension_semantics=("parallel",)),
    )(xs, a2, b2, c2)

    return out[:B, 0]


def quadratic2_forward(x, a, b, c):
    """Single-point forward, matching torch: scalar + Tensor([c]) -> shape (1,)."""
    y = quadratic2_forward_batched(x[None, :], a, b, c)
    return y.reshape((1,))


# TODO(synk): gradient()/hessian() (torch.autograd.functional.jacobian/hessian)
# are not part of the forward pass and are not implemented here.


if __name__ == "__main__":
    input_size = 8  # Quadratic2(..., input_size=8)
    batch = 16

    key = jax.random.PRNGKey(0)
    k_a, k_b, k_c, k_x, k_xs = jax.random.split(key, 5)

    # Deterministic synthetic parameters (shapes implied by the module __init__).
    a = jax.random.normal(k_a, (input_size, input_size), jnp.float32)
    b = jax.random.normal(k_b, (input_size,), jnp.float32)
    c = jax.random.normal(k_c, (), jnp.float32)
    x = jax.random.normal(k_x, (input_size,), jnp.float32)
    xs = jax.random.normal(k_xs, (batch, input_size), jnp.float32)

    y = quadratic2_forward(x, a, b, c)           # single-point (module semantics)
    ys = quadratic2_forward_batched(xs, a, b, c)  # amortized batched path
    jax.block_until_ready((y, ys))

    # Pure-JAX references (elementwise formulation -> exact f32, no MXU precision).
    y_ref = (0.5 * jnp.sum(x[:, None] * a * x[None, :])
             + jnp.sum(b * x) + c)
    ys_ref = (0.5 * jnp.sum(xs[:, :, None] * a[None, :, :] * xs[:, None, :],
                            axis=(1, 2))
              + jnp.sum(xs * b[None, :], axis=-1) + c)

    assert y.shape == (1,)
    assert jnp.allclose(y[0], y_ref, rtol=1e-5, atol=1e-5), (y, y_ref)
    assert ys.shape == (batch,)
    assert jnp.allclose(ys, ys_ref, rtol=1e-5, atol=1e-5), (ys, ys_ref)

    print("KERNEL_OK")
</pallas_src>

<mosaic_0001>
module attributes {stable_mosaic.version = 11 : i64} {
  func.func @_quadratic_kernel(%arg0: i32, %arg1: memref<8x8xf32, #tpu.memory_space<vmem>>, %arg2: memref<8x8xf32, #tpu.memory_space<vmem>>, %arg3: memref<1x8xf32, #tpu.memory_space<vmem>>, %arg4: memref<1xf32, #tpu.memory_space<smem>>, %arg5: memref<8x1xf32, #tpu.memory_space<vmem>>) attributes {dimension_semantics = [#tpu.dimension_semantics<parallel>], iteration_bounds = array<i64: 1>, scalar_prefetch = 0 : i64, scratch_operands = 0 : i64, tpu.core_type = #tpu.core_type<tc>, window_params = [{transform_indices = @transform_0, window_bounds = array<i64: 8, 8>}, {pipeline_mode = #tpu.pipeline_mode<synchronous>, transform_indices = @transform_1, window_bounds = array<i64: 8, 8>}, {pipeline_mode = #tpu.pipeline_mode<synchronous>, transform_indices = @transform_2, window_bounds = array<i64: 1, 8>}, {transform_indices = @transform_3, window_bounds = array<i64: 1>}, {transform_indices = @transform_4, window_bounds = array<i64: 8, 1>}]} {
    %c0 = arith.constant 0 : index
    %c0_0 = arith.constant 0 : index
    %0 = vector.load %arg1[%c0, %c0_0] : memref<8x8xf32, #tpu.memory_space<vmem>>, vector<8x8xf32>
    %c0_1 = arith.constant 0 : index
    %c0_2 = arith.constant 0 : index
    %1 = vector.load %arg2[%c0_1, %c0_2] : memref<8x8xf32, #tpu.memory_space<vmem>>, vector<8x8xf32>
    %cst = arith.constant 0.000000e+00 : f32
    %2 = vector.broadcast %cst : f32 to vector<8x8xf32>
    %3 = vector.extract_strided_slice %0 {offsets = [0, 0], sizes = [8, 1], strides = [1, 1]} : vector<8x8xf32> to vector<8x1xf32>
    %4 = vector.extract_strided_slice %1 {offsets = [0, 0], sizes = [1, 8], strides = [1, 1]} : vector<8x8xf32> to vector<1x8xf32>
    %5 = vector.broadcast %3 : vector<8x1xf32> to vector<8x8xf32>
    %6 = vector.broadcast %4 : vector<1x8xf32> to vector<8x8xf32>
    %7 = arith.mulf %5, %6 : vector<8x8xf32>
    %8 = arith.addf %2, %7 : vector<8x8xf32>
    %9 = vector.extract_strided_slice %0 {offsets = [0, 1], sizes = [8, 1], strides = [1, 1]} : vector<8x8xf32> to vector<8x1xf32>
    %10 = vector.extract_strided_slice %1 {offsets = [1, 0], sizes = [1, 8], strides = [1, 1]} : vector<8x8xf32> to vector<1x8xf32>
    %11 = vector.broadcast %9 : vector<8x1xf32> to vector<8x8xf32>
    %12 = vector.broadcast %10 : vector<1x8xf32> to vector<8x8xf32>
    %13 = arith.mulf %11, %12 : vector<8x8xf32>
    %14 = arith.addf %8, %13 : vector<8x8xf32>
    %15 = vector.extract_strided_slice %0 {offsets = [0, 2], sizes = [8, 1], strides = [1, 1]} : vector<8x8xf32> to vector<8x1xf32>
    %16 = vector.extract_strided_slice %1 {offsets = [2, 0], sizes = [1, 8], strides = [1, 1]} : vector<8x8xf32> to vector<1x8xf32>
    %17 = vector.broadcast %15 : vector<8x1xf32> to vector<8x8xf32>
    %18 = vector.broadcast %16 : vector<1x8xf32> to vector<8x8xf32>
    %19 = arith.mulf %17, %18 : vector<8x8xf32>
    %20 = arith.addf %14, %19 : vector<8x8xf32>
    %21 = vector.extract_strided_slice %0 {offsets = [0, 3], sizes = [8, 1], strides = [1, 1]} : vector<8x8xf32> to vector<8x1xf32>
    %22 = vector.extract_strided_slice %1 {offsets = [3, 0], sizes = [1, 8], strides = [1, 1]} : vector<8x8xf32> to vector<1x8xf32>
    %23 = vector.broadcast %21 : vector<8x1xf32> to vector<8x8xf32>
    %24 = vector.broadcast %22 : vector<1x8xf32> to vector<8x8xf32>
    %25 = arith.mulf %23, %24 : vector<8x8xf32>
    %26 = arith.addf %20, %25 : vector<8x8xf32>
    %27 = vector.extract_strided_slice %0 {offsets = [0, 4], sizes = [8, 1], strides = [1, 1]} : vector<8x8xf32> to vector<8x1xf32>
    %28 = vector.extract_strided_slice %1 {offsets = [4, 0], sizes = [1, 8], strides = [1, 1]} : vector<8x8xf32> to vector<1x8xf32>
    %29 = vector.broadcast %27 : vector<8x1xf32> to vector<8x8xf32>
    %30 = vector.broadcast %28 : vector<1x8xf32> to vector<8x8xf32>
    %31 = arith.mulf %29, %30 : vector<8x8xf32>
    %32 = arith.addf %26, %31 : vector<8x8xf32>
    %33 = vector.extract_strided_slice %0 {offsets = [0, 5], sizes = [8, 1], strides = [1, 1]} : vector<8x8xf32> to vector<8x1xf32>
    %34 = vector.extract_strided_slice %1 {offsets = [5, 0], sizes = [1, 8], strides = [1, 1]} : vector<8x8xf32> to vector<1x8xf32>
    %35 = vector.broadcast %33 : vector<8x1xf32> to vector<8x8xf32>
    %36 = vector.broadcast %34 : vector<1x8xf32> to vector<8x8xf32>
    %37 = arith.mulf %35, %36 : vector<8x8xf32>
    %38 = arith.addf %32, %37 : vector<8x8xf32>
    %39 = vector.extract_strided_slice %0 {offsets = [0, 6], sizes = [8, 1], strides = [1, 1]} : vector<8x8xf32> to vector<8x1xf32>
    %40 = vector.extract_strided_slice %1 {offsets = [6, 0], sizes = [1, 8], strides = [1, 1]} : vector<8x8xf32> to vector<1x8xf32>
    %41 = vector.broadcast %39 : vector<8x1xf32> to vector<8x8xf32>
    %42 = vector.broadcast %40 : vector<1x8xf32> to vector<8x8xf32>
    %43 = arith.mulf %41, %42 : vector<8x8xf32>
    %44 = arith.addf %38, %43 : vector<8x8xf32>
    %45 = vector.extract_strided_slice %0 {offsets = [0, 7], sizes = [8, 1], strides = [1, 1]} : vector<8x8xf32> to vector<8x1xf32>
    %46 = vector.extract_strided_slice %1 {offsets = [7, 0], sizes = [1, 8], strides = [1, 1]} : vector<8x8xf32> to vector<1x8xf32>
    %47 = vector.broadcast %45 : vector<8x1xf32> to vector<8x8xf32>
    %48 = vector.broadcast %46 : vector<1x8xf32> to vector<8x8xf32>
    %49 = arith.mulf %47, %48 : vector<8x8xf32>
    %50 = arith.addf %44, %49 : vector<8x8xf32>
    %51 = arith.mulf %50, %0 : vector<8x8xf32>
    %cst_3 = arith.constant dense<0.000000e+00> : vector<8xf32>
    %52 = vector.multi_reduction <add>, %51, %cst_3 [1] : vector<8x8xf32> to vector<8xf32>
    %53 = vector.shape_cast %52 : vector<8xf32> to vector<8x1xf32>
    %c0_4 = arith.constant 0 : index
    %c0_5 = arith.constant 0 : index
    %54 = vector.load %arg3[%c0_4, %c0_5] : memref<1x8xf32, #tpu.memory_space<vmem>>, vector<1x8xf32>
    %55 = vector.broadcast %54 : vector<1x8xf32> to vector<8x8xf32>
    %56 = arith.mulf %0, %55 : vector<8x8xf32>
    %cst_6 = arith.constant dense<0.000000e+00> : vector<8xf32>
    %57 = vector.multi_reduction <add>, %56, %cst_6 [1] : vector<8x8xf32> to vector<8xf32>
    %58 = vector.shape_cast %57 : vector<8xf32> to vector<8x1xf32>
    %cst_7 = arith.constant 5.000000e-01 : f32
    %59 = vector.broadcast %cst_7 : f32 to vector<8x1xf32>
    %60 = arith.mulf %59, %53 : vector<8x1xf32>
    %61 = arith.addf %60, %58 : vector<8x1xf32>
    %c0_8 = arith.constant 0 : index
    %62 = memref.load %arg4[%c0_8] : memref<1xf32, #tpu.memory_space<smem>>
    %63 = vector.broadcast %62 : f32 to vector<8x1xf32>
    %64 = arith.addf %61, %63 : vector<8x1xf32>
    %c0_9 = arith.constant 0 : index
    %c0_10 = arith.constant 0 : index
    %65 = vector.load %arg5[%c0_9, %c0_10] : memref<8x1xf32, #tpu.memory_space<vmem>>, vector<8x1xf32>
    tpu.vector_store %arg5[%c0_9, %c0_10], %64 {strides = array<i32>} : memref<8x1xf32, #tpu.memory_space<vmem>>, vector<8x1xf32>,
    return
  }
  func.func @transform_0(%arg0: i32) -> (i32, i32) {
    %c0_i32 = arith.constant 0 : i32
    %c0_i32_0 = arith.constant 0 : i32
    return %arg0, %c0_i32 : i32, i32
  }
  func.func @transform_1(%arg0: i32) -> (i32, i32) {
    %c0_i32 = arith.constant 0 : i32
    %c0_i32_0 = arith.constant 0 : i32
    %c0_i32_1 = arith.constant 0 : i32
    return %c0_i32, %c0_i32_0 : i32, i32
  }
  func.func @transform_2(%arg0: i32) -> (i32, i32) {
    %c0_i32 = arith.constant 0 : i32
    %c0_i32_0 = arith.constant 0 : i32
    %c0_i32_1 = arith.constant 0 : i32
    return %c0_i32, %c0_i32_0 : i32, i32
  }
  func.func @transform_3(%arg0: i32) -> i32 {
    %c0_i32 = arith.constant 0 : i32
    %c0_i32_0 = arith.constant 0 : i32
    return %c0_i32 : i32
  }
  func.func @transform_4(%arg0: i32) -> (i32, i32) {
    %c0_i32 = arith.constant 0 : i32
    %c0_i32_0 = arith.constant 0 : i32
    return %arg0, %c0_i32 : i32, i32
  }
}

</mosaic_0001>

<bundles_post_ra>
// kernel: tpu_custom_call.1
= control target key start
LH: loop header
LB: loop body
LE: loop exit
PB: predicated region body
PF: predicated region fallthrough
CT: control target
= control target key end

     0   :  { %10 = vsyncpa [#allocation4], 0  ;;  %s304_s0 = inlined_call_operand.hbm [shape: f32[8,8], index: 0, kind: input, shape index: {}]   ;;  %s305_s1 = inlined_call_operand.hbm [shape: f32[8,8], index: 1, kind: input, shape index: {}]   ;;  %s306_s2 = inlined_call_operand.vmem [shape: f32[1,8], index: 2, kind: input, shape index: {}]   ;;  %s307_s3 = inlined_call_operand.<no memory space> [shape: f32[1], index: 3, kind: input, shape index: {}]   ;;  %s308_s4 = inlined_call_operand.vmem [shape: f32[8,1], index: 4, kind: output, shape index: {}]  }
   0x1   :  { %11 = vsyncpa [#allocation6], 0  ;;  %s222_s15 = smov [#allocation3]   ;;  %s223_s17 = smov [#allocation5]  }
   0x2   :  { %s18_s16 = sshll.u32 %s222_s15, 4  ;;  %s28_s18 = sshll.u32 %s223_s17, 4  ;;  %s19_s16 = int_to_ptr.vmem [resolvable:$true] %s18_s16  ;;  %s29_s18 = int_to_ptr.vmem [resolvable:$true] %s28_s18 }
   0x3   :  { %s174_s21 = scalar_lea.hbm %s304_s0, 128 }
   0x4   :  { %p175_p0 = scmp.ne.s32.totalorder %s304_s0, %s174_s21  ;;  %p178_p1 = scmp.lt.u32.totalorder %s174_s21, %s304_s0 }
   0x6   :  { %p180_p2 = pnand %p178_p1, %p175_p0 }
   0x8   :  { %183 = shalt.err (!%p180_p2)
}
   0x9   :  { %s184_s26 = scalar_lea.vmem %s19_s16, 128  ;;  %p189_p4 = scmp.lt.s32.totalorder %s19_s16, %s19_s16 }
   0xa   :  { %p185_p3 = scmp.ne.s32.totalorder %s19_s16, %s184_s26  ;;  %p190_p5 = scmp.lt.s32.totalorder %s184_s26, %s184_s26 }
   0xc   :  { %p191_p6 = por %p190_p5, %p189_p4 }
   0xe   :  { %p192_p7 = pnand %p191_p6, %p185_p3 }
  0x10   :  { %195 = shalt.err (!%p192_p7)
}
  0x11   :  { %21 = dma.hbm_to_vmem [thread:$0]  %s304_s0, 128, %s19_s16, [#allocation4]  }
  0x12   :  { %s196_s5 = scalar_lea.hbm %s305_s1, 128 }
  0x13   :  { %p197_p8 = scmp.ne.s32.totalorder %s305_s1, %s196_s5  ;;  %p200_p9 = scmp.lt.u32.totalorder %s196_s5, %s305_s1 }
  0x15   :  { %p202_p10 = pnand %p200_p9, %p197_p8 }
  0x17   :  { %205 = shalt.err (!%p202_p10)
}
  0x18   :  { %s206_s10 = scalar_lea.vmem %s29_s18, 128  ;;  %p211_p12 = scmp.lt.s32.totalorder %s29_s18, %s29_s18 }
  0x19   :  { %p207_p11 = scmp.ne.s32.totalorder %s29_s18, %s206_s10  ;;  %p212_p13 = scmp.lt.s32.totalorder %s206_s10, %s206_s10 }
  0x1b   :  { %p213_p0 = por %p212_p13, %p211_p12 }
  0x1d   :  { %p214_p1 = pnand %p213_p0, %p207_p11 }
  0x1f   :  { %217 = shalt.err (!%p214_p1)
}
  0x20   :  { %31 = dma.hbm_to_vmem [thread:$0]  %s305_s1, 128, %s29_s18, [#allocation6]  }
  0x21   :  { %218 = dma.done.wait [#allocation4], 128  }
  0x22   :  { %219 = vsyncadd [#allocation4], 4294967168 }
  0x23   :  { %220 = dma.done.wait [#allocation6], 128  }
  0x24   :  { %221 = vsyncadd [#allocation6], 4294967168  ;;  %v224_v0 = vmov 2   ;;  %v225_v1 = vmov 0   ;;  %v281_v2 = vld [vmem:[#allocation3] sm:$0xff]  ;;  %v226_v3 = vmov 3   ;;  %v49_v12 = vlaneseq }
  0x25   :  { %167 = vset.pattern.permute.xlu1 %v224_v0  ;;  %165 = vset.pattern.permute.xlu0 %v225_v1  ;;  %v227_v4 = vmov 1   ;;  %v228_v5 = vmov 4   ;;  %v229_v6 = vmov 5   ;;  %v230_v7 = vmov 6   ;;  %v154_v9 = vld [vmem:[%s306_s2] ss:$0 sm:$0xff] }
  0x26   :  { %66 = vperm.xlu1 %167, %v281_v2   ;;  %46 = vperm.xlu0 %165, %v281_v2   ;;  %v231_v8 = vmov 7   ;;  %v137_v10 = vmul.f32 %v154_v9, %v281_v2  ;;  %vm126_vm0 = vcmask 64512   ;;  %v50_v13 = vshrl.u32 %v49_v12, 7  ;;  %v43_v19 = vld [vmem:[#allocation5] sm:$0xff] }
  0x27   :  { %v144_v59 = vstv %s307_s3  ;;  %vm146_vm1 = vcmask 7168  }
  0x28   :  { %v138_v11 = vsel %vm126_vm0, %v137_v10, 0.0  ;;  %v51_v14 = vsub.s32 0, %v50_v13  ;;  %v61_v15 = vsub.s32 1, %v50_v13  ;;  %v71_v16 = vsub.s32 2, %v50_v13 }
  0x29   :  { %v81_v21 = vsub.s32 3, %v50_v13  ;;  %v91_v23 = vsub.s32 4, %v50_v13  ;;  %v101_v27 = vsub.s32 5, %v50_v13  ;;  %v111_v35 = vsub.s32 6, %v50_v13 }
  0x2a   :  { %168 = vset.pattern.permute.xlu1 %v226_v3  ;;  %166 = vset.pattern.permute.xlu0 %v227_v4  ;;  %v52_v20 = vrot.slane %v43_v19, %v51_v14  ;;  %v62_v22 = vrot.slane %v43_v19, %v61_v15  ;;  %v72_v24 = vrot.slane %v43_v19, %v71_v16  ;;  %v121_v44 = vsub.s32 7, %v50_v13 }
  0x2b   :  { %76 = vperm.xlu1 %168, %v281_v2   ;;  %56 = vperm.xlu0 %166, %v281_v2   ;;  %v82_v29 = vrot.slane %v43_v19, %v81_v21  ;;  %v92_v31 = vrot.slane %v43_v19, %v91_v23  ;;  %v102_v34 = vrot.slane %v43_v19, %v101_v27 }
  0x2c   :  { %v112_v43 = vrot.slane %v43_v19, %v111_v35  ;;  %v122_v49 = vrot.slane %v43_v19, %v121_v44 }
  0x2f   :  { %169 = vset.pattern.permute.xlu1 %v228_v5  ;;  %170 = vset.pattern.permute.xlu0 %v229_v6 }
  0x30   :  { %86 = vperm.xlu1 %169, %v281_v2   ;;  %96 = vperm.xlu0 %170, %v281_v2  }
  0x34   :  { %171 = vset.pattern.permute.xlu1 %v230_v7  ;;  %173 = vset.pattern.permute.xlu0 %v231_v8 }
  0x35   :  { %106 = vperm.xlu1 %171, %v281_v2  }
  0x39   :  { %172 = vset.pattern.permute.xlu1 %v231_v8 }
  0x3a   :  { %116 = vperm.xlu1 %172, %v281_v2  }
  0x5e   :  { %139 = vadd.xlane.f32.xlu1 %v138_v11 }
  0xa5   :  { %v67_v17 = vpop.permute.xlu1 %66  ;;  %v47_v18 = vpop.permute.xlu0 %46 }
  0xa6   :  { %v53_v28 = vmul.f32 %v52_v20, %v47_v18  ;;  %v73_v32 = vmul.f32 %v72_v24, %v67_v17 }
  0xaa   :  { %v77_v25 = vpop.permute.xlu1 %76  ;;  %v57_v26 = vpop.permute.xlu0 %56 }
  0xab   :  { %v63_v30 = vmul.f32 %v62_v22, %v57_v26  ;;  %v83_v36 = vmul.f32 %v82_v29, %v77_v25 }
  0xad   :  { %v64_v33 = vadd.f32 %v63_v30, %v53_v28 }
  0xaf   :  { %v74_v37 = vadd.f32 %v73_v32, %v64_v33  ;;  %v87_v38 = vpop.permute.xlu1 %86  ;;  %v97_v39 = vpop.permute.xlu0 %96 }
  0xb0   :  { %v93_v40 = vmul.f32 %v92_v31, %v87_v38  ;;  %v103_v42 = vmul.f32 %v102_v34, %v97_v39 }
  0xb1   :  { %v84_v41 = vadd.f32 %v83_v36, %v74_v37 }
  0xb3   :  { %v94_v45 = vadd.f32 %v93_v40, %v84_v41 }
  0xb4   :  { %v107_v46 = vpop.permute.xlu1 %106 }
  0xb5   :  { %v104_v47 = vadd.f32 %v103_v42, %v94_v45  ;;  %v113_v48 = vmul.f32 %v112_v43, %v107_v46 }
  0xb7   :  { %v114_v51 = vadd.f32 %v113_v48, %v104_v47 }
  0xb9   :  { %v117_v50 = vpop.permute.xlu1 %116 }
  0xba   :  { %v123_v52 = vmul.f32 %v122_v49, %v117_v50 }
  0xbc   :  { %v124_v53 = vadd.f32 %v123_v52, %v114_v51 }
  0xbe   :  { %v125_v54 = vmul.f32 %v124_v53, %v281_v2 }
  0xc0   :  { %v127_v55 = vsel %vm126_vm0, %v125_v54, 0.0 }
  0xc1   :  { %128 = vadd.xlane.f32.xlu0 %v127_v55 }
  0xeb   :  { %v140_v57 = vpop.xlane.xlu1 %139 }
 0x14e   :  { %v129_v56 = vpop.xlane.xlu0 %128 }
 0x14f   :  { %v141_v58 = vmul.f32 0.5, %v129_v56 }
 0x151   :  { %v142_v60 = vadd.f32 %v141_v58, %v140_v57 }
 0x153   :  { %v145_v61 = vadd.f32 %v144_v59, %v142_v60 }
 0x155   :  { %147 = vst.msk [vmem:[%s308_s4] sm:$0xff] %vm146_vm1, %v145_v61 }
 0x156   :  { %152 = vsyncpa [#allocation4], 1 }
 0x157   :  { %153 = vsyncpa [#allocation6], 1 }

</bundles_post_ra>
